<compile_context>
chip_gen: v5e
topology: v5e:2x2
jax: 0.10.0
libtpu: 0.0.40
codegen_flags: <defaults>
</compile_context>

<pallas_src>
import functools

import jax
import jax.numpy as jnp
from jax.experimental import pallas as pl
from jax.experimental.pallas import tpu as pltpu


def _conv_in_stage(x, w_big, bias_col, masks, H, W, apply_relu, eps):
    """ReflectPad(1) + Conv3x3 + bias + InstanceNorm2d(affine=False) [+ ReLU]
    on a lane-dense activation tile.

    x        : (R, HW)   R = images_per_block * C rows; lane l = y*W + x
    w_big    : (R, 9*R)  block-diagonal (over packed images) conv weights
    bias_col : (R, 1)
    masks    : (is_x0, is_xW, is_y0, is_yH), each (1, HW), implicit broadcast
    """
    R, HW = x.shape
    is_x0, is_xW, is_y0, is_yH = masks

    # Reflected spatial shifts via XLU lane rotations.  pltpu.roll requires a
    # non-negative shift; rotation is modular so a shift of HW-k == -k.
    # Semantics: roll(x, s)[l] == x[l - s].
    r_m1 = pltpu.roll(x, shift=HW - 1, axis=1)   # value at x+1 (wraps at row end)
    r_p1 = pltpu.roll(x, shift=1, axis=1)        # value at x-1 (wraps at row start)
    left = jnp.where(is_x0, r_m1, r_p1)          # x-1, reflected at x == 0
    right = jnp.where(is_xW, r_p1, r_m1)         # x+1, reflected at x == W-1

    taps = [None] * 9                            # tap index t = kh*3 + kw
    for kw, hsrc in enumerate((left, x, right)):
        up_r = pltpu.roll(hsrc, shift=W, axis=1)        # value at y-1 (wraps at top)
        dn_r = pltpu.roll(hsrc, shift=HW - W, axis=1)   # value at y+1 (wraps at bottom)
        taps[0 * 3 + kw] = jnp.where(is_y0, dn_r, up_r)   # y-1, reflected
        taps[1 * 3 + kw] = hsrc                           # y
        taps[2 * 3 + kw] = jnp.where(is_yH, up_r, dn_r)   # y+1, reflected

    # 3x3 conv as ONE MXU matmul over a stacked im2col tile: (R,9R) @ (9R,HW).
    col = jnp.concatenate(taps, axis=0)                          # (9R, HW)
    y = jnp.dot(w_big, col, preferred_element_type=jnp.float32) + bias_col

    # InstanceNorm2d (affine=False): one-pass stats per (image, channel) row,
    # biased variance, clamped against catastrophic cancellation.
    inv_n = 1.0 / HW
    mean = jnp.sum(y, axis=1, keepdims=True) * inv_n
    ex2 = jnp.sum(y * y, axis=1, keepdims=True) * inv_n
    var = jnp.maximum(ex2 - mean * mean, 0.0)
    y = (y - mean) * jax.lax.rsqrt(var + eps)

    if apply_relu:
        y = jnp.maximum(y, 0.0)
    return y


def resnet_block_kernel(x_ref, p_ref, o_ref, *, H, W, R, eps):
    """Fused conv_block2 (both conv+IN stages) for one block of packed images.
    Blocks: x_ref/o_ref (1, R, H*W); p_ref (2, R, 9*R + 1) = [w_big | bias]."""
    HW = H * W
    x = x_ref[0].astype(jnp.float32)                       # (R, HW)

    # Boundary masks for reflection padding; kept (1, HW), broadcast implicitly.
    lane = jax.lax.broadcasted_iota(jnp.int32, (1, HW), 1)
    xpos = (lane & (W - 1)) if ((W & (W - 1)) == 0) else (lane % W)
    masks = (xpos == 0, xpos == W - 1, lane < W, lane >= HW - W)

    params = p_ref[...].astype(jnp.float32)                # (2, R, 9R+1)
    K = 9 * R
    w1, b1 = params[0, :, :K], params[0, :, K:K + 1]
    w2, b2 = params[1, :, :K], params[1, :, K:K + 1]

    h = _conv_in_stage(x, w1, b1, masks, H, W, apply_relu=True, eps=eps)
    y = _conv_in_stage(h, w2, b2, masks, H, W, apply_relu=False, eps=eps)
    o_ref[0] = y.astype(o_ref.dtype)


def prepare_resnet_block_params(block2_params, images_per_block):
    """One-time (per parameter load) re-layout of conv_block2's weights into the
    kernel's packed matmul operand.  Hoisted OUT of the per-call wrapper.

    Returns (2, R, 9*R + 1) f32 with R = images_per_block * C:
      [..., :9R]     block-diagonal (over packed images) conv weights
      [..., 9R:9R+1] bias column
    """
    w1, b1, w2, b2 = block2_params          # HWIO (3,3,C,C) weights, (C,) biases
    C = w1.shape[-1]
    nb = images_per_block

    def pack_stage(w_hwio, b):
        # w_oi[t, co, ci] = w_hwio[t // 3, t % 3, ci, co]
        w_oi = jnp.transpose(w_hwio.reshape(9, C, C), (0, 2, 1)).astype(jnp.float32)
        eye = jnp.eye(nb, dtype=jnp.float32)
        # big[n, co, t, m, ci] = [n == m] * w_oi[t, co, ci]
        big = jnp.einsum("nm,toi->notmi", eye, w_oi)
        w_big = big.reshape(nb * C, 9 * nb * C)
        b_col = jnp.tile(b.astype(jnp.float32), nb).reshape(nb * C, 1)
        return jnp.concatenate([w_big, b_col], axis=1)

    return jnp.stack([pack_stage(w1, b1), pack_stage(w2, b2)], axis=0)


def default_images_per_block(N, C, sublanes=8):
    """Pack images until a full 8-sublane f32 vreg is used (best for single-TC
    v5e/v6e: fewer serial grid steps, full vregs).  On v7x (2 TCs/chip) pass
    images_per_block=1 instead so grid=(N,) parallel feeds both TensorCores."""
    nb = max(1, min(N, sublanes // max(C, 1)))
    while N % nb:
        nb -= 1
    return nb


def resnet_block_forward(x_nchw, packed_params, *, images_per_block, eps=1e-5):
    """Exact ResnetBlock.forward semantics: returns conv_block2(x).
    (`out = x + conv_block1(x)` in the PyTorch forward is dead code.)"""
    N, C, H, W = x_nchw.shape
    assert H >= 2 and W >= 2, "reflection padding needs H, W >= 2"
    nb = images_per_block
    assert N % nb == 0
    G = N // nb
    R = nb * C
    HW = H * W

    # Activations: free reshape only (stays channel-major, no NCHW<->NHWC).
    x2 = x_nchw.reshape(G, R, HW)

    kern = functools.partial(resnet_block_kernel, H=H, W=W, R=R, eps=eps)
    flops = G * 2 * (2 * R * (9 * R) * HW)                 # two conv stages (MXU)
    bytes_accessed = 2 * N * C * HW * 4 + int(packed_params.size) * 4
    cost = pl.CostEstimate(flops=flops, transcendentals=2 * N * C,
                           bytes_accessed=bytes_accessed)

    out = pl.pallas_call(
        kern,
        out_shape=jax.ShapeDtypeStruct((G, R, HW), x_nchw.dtype),
        grid=(G,),
        in_specs=[
            pl.BlockSpec((1, R, HW), lambda g: (g, 0, 0)),
            pl.BlockSpec((2, R, 9 * R + 1), lambda g: (0, 0, 0)),
        ],
        out_specs=pl.BlockSpec((1, R, HW), lambda g: (g, 0, 0)),
        compiler_params=pltpu.CompilerParams(
            dimension_semantics=("parallel",),
            vmem_limit_bytes=32 * 1024 * 1024),
        cost_estimate=cost,
    )(x2, packed_params)
    return out.reshape(N, C, H, W)


# ------------------------- pure-JAX reference -------------------------------

def _ref_stage(x, w, b, relu, eps=1e-5):
    xp = jnp.pad(x, ((0, 0), (1, 1), (1, 1), (0, 0)), mode="reflect")
    y = jax.lax.conv_general_dilated(
        xp, w, window_strides=(1, 1), padding="VALID",
        dimension_numbers=("NHWC", "HWIO", "NHWC"))
    y = y + b[None, None, None, :]
    mean = jnp.mean(y, axis=(1, 2), keepdims=True)
    var = jnp.mean((y - mean) ** 2, axis=(1, 2), keepdims=True)
    y = (y - mean) * jax.lax.rsqrt(var + eps)
    return jnp.maximum(y, 0.0) if relu else y


def resnet_block_reference(x_nchw, block2_params):
    w1, b1, w2, b2 = block2_params
    x = jnp.transpose(x_nchw, (0, 2, 3, 1))
    h = _ref_stage(x, w1, b1, True)
    y = _ref_stage(h, w2, b2, False)
    return jnp.transpose(y, (0, 3, 1, 2))


# ------------------------------- main ----------------------------------------

if __name__ == "__main__":
    N, C, H, W = 2, 4, 16, 16          # batch=2, dim=4, spatial=16
    key = jax.random.PRNGKey(0)
    kx, k1, k2, k3, k4, k5, k6, k7, k8 = jax.random.split(key, 9)

    x = jax.random.normal(kx, (N, C, H, W), dtype=jnp.float32)

    def make_block_params(ka, kb, kc, kd):
        # HWIO conv weights, deterministic init (stand-in for torch default init)
        wa = 0.1 * jax.random.normal(ka, (3, 3, C, C), dtype=jnp.float32)
        ba = 0.1 * jax.random.normal(kb, (C,), dtype=jnp.float32)
        wb = 0.1 * jax.random.normal(kc, (3, 3, C, C), dtype=jnp.float32)
        bb = 0.1 * jax.random.normal(kd, (C,), dtype=jnp.float32)
        return (wa, ba, wb, bb)

    block1_params = make_block_params(k1, k2, k3, k4)   # dead code in forward
    block2_params = make_block_params(k5, k6, k7, k8)

    # v5e/v6e default: pack both images into one (8, 256) tile.
    # On v7x set nb = 1 to keep grid=(N,) parallel across both TensorCores.
    nb = default_images_per_block(N, C)
    packed = prepare_resnet_block_params(block2_params, nb)   # one-time re-layout

    fwd = jax.jit(functools.partial(resnet_block_forward, images_per_block=nb))
    out = jax.block_until_ready(fwd(x, packed))

    ref = resnet_block_reference(x, block2_params)
    assert out.shape == (N, C, H, W)
    assert jnp.max(jnp.abs(out - ref)) < 1e-3

    print("KERNEL_OK")
</pallas_src>

<mosaic_0001>
module attributes {stable_mosaic.version = 11 : i64} {
  func.func @resnet_block_kernel(%arg0: i32, %arg1: memref<1x8x256xf32, #tpu.memory_space<vmem>>, %arg2: memref<2x8x73xf32, #tpu.memory_space<vmem>>, %arg3: memref<1x8x256xf32, #tpu.memory_space<vmem>>) attributes {dimension_semantics = [#tpu.dimension_semantics<parallel>], iteration_bounds = array<i64: 1>, scalar_prefetch = 0 : i64, scratch_operands = 0 : i64, tpu.core_type = #tpu.core_type<tc>, window_params = [{transform_indices = @transform_0, window_bounds = array<i64: 1, 8, 256>}, {pipeline_mode = #tpu.pipeline_mode<synchronous>, transform_indices = @transform_1, window_bounds = array<i64: 2, 8, 73>}, {transform_indices = @transform_2, window_bounds = array<i64: 1, 8, 256>}]} {
    %c0 = arith.constant 0 : index
    %c0_0 = arith.constant 0 : index
    %c0_1 = arith.constant 0 : index
    %0 = vector.load %arg1[%c0, %c0_0, %c0_1] : memref<1x8x256xf32, #tpu.memory_space<vmem>>, vector<1x8x256xf32>
    %1 = vector.shape_cast %0 : vector<1x8x256xf32> to vector<8x256xf32>
    %2 = tpu.iota {dimensions = array<i32: 1>} : vector<1x256xi32>
    %c15_i32 = arith.constant 15 : i32
    %3 = vector.broadcast %c15_i32 : i32 to vector<1x256xi32>
    %4 = arith.andi %2, %3 : vector<1x256xi32>
    %c0_i32 = arith.constant 0 : i32
    %5 = vector.broadcast %c0_i32 : i32 to vector<1x256xi32>
    %6 = arith.cmpi eq, %4, %5 : vector<1x256xi32>
    %c15_i32_2 = arith.constant 15 : i32
    %7 = vector.broadcast %c15_i32_2 : i32 to vector<1x256xi32>
    %8 = arith.cmpi eq, %4, %7 : vector<1x256xi32>
    %c16_i32 = arith.constant 16 : i32
    %9 = vector.broadcast %c16_i32 : i32 to vector<1x256xi32>
    %10 = arith.cmpi slt, %2, %9 : vector<1x256xi32>
    %c240_i32 = arith.constant 240 : i32
    %11 = vector.broadcast %c240_i32 : i32 to vector<1x256xi32>
    %12 = arith.cmpi sge, %2, %11 : vector<1x256xi32>
    %c0_3 = arith.constant 0 : index
    %c0_4 = arith.constant 0 : index
    %c0_5 = arith.constant 0 : index
    %13 = vector.load %arg2[%c0_3, %c0_4, %c0_5] : memref<2x8x73xf32, #tpu.memory_space<vmem>>, vector<2x8x73xf32>
    %14 = vector.extract_strided_slice %13 {offsets = [0, 0, 0], sizes = [1, 8, 72], strides = [1, 1, 1]} : vector<2x8x73xf32> to vector<1x8x72xf32>
    %15 = vector.shape_cast %14 : vector<1x8x72xf32> to vector<8x72xf32>
    %16 = vector.extract_strided_slice %13 {offsets = [0, 0, 72], sizes = [1, 8, 1], strides = [1, 1, 1]} : vector<2x8x73xf32> to vector<1x8x1xf32>
    %17 = vector.shape_cast %16 : vector<1x8x1xf32> to vector<8x1xf32>
    %18 = vector.extract_strided_slice %13 {offsets = [1, 0, 0], sizes = [1, 8, 72], strides = [1, 1, 1]} : vector<2x8x73xf32> to vector<1x8x72xf32>
    %19 = vector.shape_cast %18 : vector<1x8x72xf32> to vector<8x72xf32>
    %20 = vector.extract_strided_slice %13 {offsets = [1, 0, 72], sizes = [1, 8, 1], strides = [1, 1, 1]} : vector<2x8x73xf32> to vector<1x8x1xf32>
    %21 = vector.shape_cast %20 : vector<1x8x1xf32> to vector<8x1xf32>
    %c255_i32 = arith.constant 255 : i32
    %22 = tpu.dynamic_rotate %1 by %c255_i32 dim 1 : vector<8x256xf32>, i32 -> vector<8x256xf32>
    %c1_i32 = arith.constant 1 : i32
    %23 = tpu.dynamic_rotate %1 by %c1_i32 dim 1 : vector<8x256xf32>, i32 -> vector<8x256xf32>
    %24 = vector.shape_cast %6 : vector<1x256xi1> to vector<1x256xi1>
    %25 = vector.broadcast %24 : vector<1x256xi1> to vector<8x256xi1>
    %26 = arith.select %25, %22, %23 : vector<8x256xi1>, vector<8x256xf32>
    %27 = vector.shape_cast %8 : vector<1x256xi1> to vector<1x256xi1>
    %28 = vector.broadcast %27 : vector<1x256xi1> to vector<8x256xi1>
    %29 = arith.select %28, %23, %22 : vector<8x256xi1>, vector<8x256xf32>
    %c16_i32_6 = arith.constant 16 : i32
    %30 = tpu.dynamic_rotate %26 by %c16_i32_6 dim 1 : vector<8x256xf32>, i32 -> vector<8x256xf32>
    %c240_i32_7 = arith.constant 240 : i32
    %31 = tpu.dynamic_rotate %26 by %c240_i32_7 dim 1 : vector<8x256xf32>, i32 -> vector<8x256xf32>
    %32 = vector.shape_cast %10 : vector<1x256xi1> to vector<1x256xi1>
    %33 = vector.broadcast %32 : vector<1x256xi1> to vector<8x256xi1>
    %34 = arith.select %33, %31, %30 : vector<8x256xi1>, vector<8x256xf32>
    %35 = vector.shape_cast %12 : vector<1x256xi1> to vector<1x256xi1>
    %36 = vector.broadcast %35 : vector<1x256xi1> to vector<8x256xi1>
    %37 = arith.select %36, %30, %31 : vector<8x256xi1>, vector<8x256xf32>
    %c16_i32_8 = arith.constant 16 : i32
    %38 = tpu.dynamic_rotate %1 by %c16_i32_8 dim 1 : vector<8x256xf32>, i32 -> vector<8x256xf32>
    %c240_i32_9 = arith.constant 240 : i32
    %39 = tpu.dynamic_rotate %1 by %c240_i32_9 dim 1 : vector<8x256xf32>, i32 -> vector<8x256xf32>
    %40 = vector.shape_cast %10 : vector<1x256xi1> to vector<1x256xi1>
    %41 = vector.broadcast %40 : vector<1x256xi1> to vector<8x256xi1>
    %42 = arith.select %41, %39, %38 : vector<8x256xi1>, vector<8x256xf32>
    %43 = vector.shape_cast %12 : vector<1x256xi1> to vector<1x256xi1>
    %44 = vector.broadcast %43 : vector<1x256xi1> to vector<8x256xi1>
    %45 = arith.select %44, %38, %39 : vector<8x256xi1>, vector<8x256xf32>
    %c16_i32_10 = arith.constant 16 : i32
    %46 = tpu.dynamic_rotate %29 by %c16_i32_10 dim 1 : vector<8x256xf32>, i32 -> vector<8x256xf32>
    %c240_i32_11 = arith.constant 240 : i32
    %47 = tpu.dynamic_rotate %29 by %c240_i32_11 dim 1 : vector<8x256xf32>, i32 -> vector<8x256xf32>
    %48 = vector.shape_cast %10 : vector<1x256xi1> to vector<1x256xi1>
    %49 = vector.broadcast %48 : vector<1x256xi1> to vector<8x256xi1>
    %50 = arith.select %49, %47, %46 : vector<8x256xi1>, vector<8x256xf32>
    %51 = vector.shape_cast %12 : vector<1x256xi1> to vector<1x256xi1>
    %52 = vector.broadcast %51 : vector<1x256xi1> to vector<8x256xi1>
    %53 = arith.select %52, %46, %47 : vector<8x256xi1>, vector<8x256xf32>
    %54 = tpu.concatenate %34, %42, %50, %26, %1, %29, %37, %45, %53 in 0 : vector<8x256xf32>, vector<8x256xf32>, vector<8x256xf32>, vector<8x256xf32>, vector<8x256xf32>, vector<8x256xf32>, vector<8x256xf32>, vector<8x256xf32>, vector<8x256xf32> -> vector<72x256xf32>
    %cst = arith.constant dense<0.000000e+00> : vector<8x256xf32>
    %55 = tpu.matmul %15, %54, %cst {dimension_numbers = #tpu.dot_dimension_numbers<[1], [0], [0], [1], [0, 0, 1, 1], [], []>} : vector<8x72xf32>, vector<72x256xf32>, vector<8x256xf32> -> vector<8x256xf32>
    %56 = vector.broadcast %17 : vector<8x1xf32> to vector<8x256xf32>
    %57 = arith.addf %55, %56 : vector<8x256xf32>
    %cst_12 = arith.constant dense<0.000000e+00> : vector<8xf32>
    %58 = vector.multi_reduction <add>, %57, %cst_12 [1] : vector<8x256xf32> to vector<8xf32>
    %59 = vector.shape_cast %58 : vector<8xf32> to vector<8x1xf32>
    %cst_13 = arith.constant 3.906250e-03 : f32
    %60 = vector.broadcast %cst_13 : f32 to vector<8x1xf32>
    %61 = arith.mulf %59, %60 : vector<8x1xf32>
    %62 = arith.mulf %57, %57 : vector<8x256xf32>
    %cst_14 = arith.constant dense<0.000000e+00> : vector<8xf32>
    %63 = vector.multi_reduction <add>, %62, %cst_14 [1] : vector<8x256xf32> to vector<8xf32>
    %64 = vector.shape_cast %63 : vector<8xf32> to vector<8x1xf32>
    %cst_15 = arith.constant 3.906250e-03 : f32
    %65 = vector.broadcast %cst_15 : f32 to vector<8x1xf32>
    %66 = arith.mulf %64, %65 : vector<8x1xf32>
    %67 = arith.mulf %61, %61 : vector<8x1xf32>
    %68 = arith.subf %66, %67 : vector<8x1xf32>
    %cst_16 = arith.constant 0.000000e+00 : f32
    %69 = vector.broadcast %cst_16 : f32 to vector<8x1xf32>
    %70 = arith.maximumf %68, %69 : vector<8x1xf32>
    %71 = vector.broadcast %61 : vector<8x1xf32> to vector<8x256xf32>
    %72 = arith.subf %57, %71 : vector<8x256xf32>
    %cst_17 = arith.constant 9.99999974E-6 : f32
    %73 = vector.broadcast %cst_17 : f32 to vector<8x1xf32>
    %74 = arith.addf %70, %73 : vector<8x1xf32>
    %75 = math.rsqrt %74 : vector<8x1xf32>
    %76 = vector.broadcast %75 : vector<8x1xf32> to vector<8x256xf32>
    %77 = arith.mulf %72, %76 : vector<8x256xf32>
    %cst_18 = arith.constant 0.000000e+00 : f32
    %78 = vector.broadcast %cst_18 : f32 to vector<8x256xf32>
    %79 = arith.maximumf %77, %78 : vector<8x256xf32>
    %c255_i32_19 = arith.constant 255 : i32
    %80 = tpu.dynamic_rotate %79 by %c255_i32_19 dim 1 : vector<8x256xf32>, i32 -> vector<8x256xf32>
    %c1_i32_20 = arith.constant 1 : i32
    %81 = tpu.dynamic_rotate %79 by %c1_i32_20 dim 1 : vector<8x256xf32>, i32 -> vector<8x256xf32>
    %82 = vector.shape_cast %6 : vector<1x256xi1> to vector<1x256xi1>
    %83 = vector.broadcast %82 : vector<1x256xi1> to vector<8x256xi1>
    %84 = arith.select %83, %80, %81 : vector<8x256xi1>, vector<8x256xf32>
    %85 = vector.shape_cast %8 : vector<1x256xi1> to vector<1x256xi1>
    %86 = vector.broadcast %85 : vector<1x256xi1> to vector<8x256xi1>
    %87 = arith.select %86, %81, %80 : vector<8x256xi1>, vector<8x256xf32>
    %c16_i32_21 = arith.constant 16 : i32
    %88 = tpu.dynamic_rotate %84 by %c16_i32_21 dim 1 : vector<8x256xf32>, i32 -> vector<8x256xf32>
    %c240_i32_22 = arith.constant 240 : i32
    %89 = tpu.dynamic_rotate %84 by %c240_i32_22 dim 1 : vector<8x256xf32>, i32 -> vector<8x256xf32>
    %90 = vector.shape_cast %10 : vector<1x256xi1> to vector<1x256xi1>
    %91 = vector.broadcast %90 : vector<1x256xi1> to vector<8x256xi1>
    %92 = arith.select %91, %89, %88 : vector<8x256xi1>, vector<8x256xf32>
    %93 = vector.shape_cast %12 : vector<1x256xi1> to vector<1x256xi1>
    %94 = vector.broadcast %93 : vector<1x256xi1> to vector<8x256xi1>
    %95 = arith.select %94, %88, %89 : vector<8x256xi1>, vector<8x256xf32>
    %c16_i32_23 = arith.constant 16 : i32
    %96 = tpu.dynamic_rotate %79 by %c16_i32_23 dim 1 : vector<8x256xf32>, i32 -> vector<8x256xf32>
    %c240_i32_24 = arith.constant 240 : i32
    %97 = tpu.dynamic_rotate %79 by %c240_i32_24 dim 1 : vector<8x256xf32>, i32 -> vector<8x256xf32>
    %98 = vector.shape_cast %10 : vector<1x256xi1> to vector<1x256xi1>
    %99 = vector.broadcast %98 : vector<1x256xi1> to vector<8x256xi1>
    %100 = arith.select %99, %97, %96 : vector<8x256xi1>, vector<8x256xf32>
    %101 = vector.shape_cast %12 : vector<1x256xi1> to vector<1x256xi1>
    %102 = vector.broadcast %101 : vector<1x256xi1> to vector<8x256xi1>
    %103 = arith.select %102, %96, %97 : vector<8x256xi1>, vector<8x256xf32>
    %c16_i32_25 = arith.constant 16 : i32
    %104 = tpu.dynamic_rotate %87 by %c16_i32_25 dim 1 : vector<8x256xf32>, i32 -> vector<8x256xf32>
    %c240_i32_26 = arith.constant 240 : i32
    %105 = tpu.dynamic_rotate %87 by %c240_i32_26 dim 1 : vector<8x256xf32>, i32 -> vector<8x256xf32>
    %106 = vector.shape_cast %10 : vector<1x256xi1> to vector<1x256xi1>
    %107 = vector.broadcast %106 : vector<1x256xi1> to vector<8x256xi1>
    %108 = arith.select %107, %105, %104 : vector<8x256xi1>, vector<8x256xf32>
    %109 = vector.shape_cast %12 : vector<1x256xi1> to vector<1x256xi1>
    %110 = vector.broadcast %109 : vector<1x256xi1> to vector<8x256xi1>
    %111 = arith.select %110, %104, %105 : vector<8x256xi1>, vector<8x256xf32>
    %112 = tpu.concatenate %92, %100, %108, %84, %79, %87, %95, %103, %111 in 0 : vector<8x256xf32>, vector<8x256xf32>, vector<8x256xf32>, vector<8x256xf32>, vector<8x256xf32>, vector<8x256xf32>, vector<8x256xf32>, vector<8x256xf32>, vector<8x256xf32> -> vector<72x256xf32>
    %cst_27 = arith.constant dense<0.000000e+00> : vector<8x256xf32>
    %113 = tpu.matmul %19, %112, %cst_27 {dimension_numbers = #tpu.dot_dimension_numbers<[1], [0], [0], [1], [0, 0, 1, 1], [], []>} : vector<8x72xf32>, vector<72x256xf32>, vector<8x256xf32> -> vector<8x256xf32>
    %114 = vector.broadcast %21 : vector<8x1xf32> to vector<8x256xf32>
    %115 = arith.addf %113, %114 : vector<8x256xf32>
    %cst_28 = arith.constant dense<0.000000e+00> : vector<8xf32>
    %116 = vector.multi_reduction <add>, %115, %cst_28 [1] : vector<8x256xf32> to vector<8xf32>
    %117 = vector.shape_cast %116 : vector<8xf32> to vector<8x1xf32>
    %cst_29 = arith.constant 3.906250e-03 : f32
    %118 = vector.broadcast %cst_29 : f32 to vector<8x1xf32>
    %119 = arith.mulf %117, %118 : vector<8x1xf32>
    %120 = arith.mulf %115, %115 : vector<8x256xf32>
    %cst_30 = arith.constant dense<0.000000e+00> : vector<8xf32>
    %121 = vector.multi_reduction <add>, %120, %cst_30 [1] : vector<8x256xf32> to vector<8xf32>
    %122 = vector.shape_cast %121 : vector<8xf32> to vector<8x1xf32>
    %cst_31 = arith.constant 3.906250e-03 : f32
    %123 = vector.broadcast %cst_31 : f32 to vector<8x1xf32>
    %124 = arith.mulf %122, %123 : vector<8x1xf32>
    %125 = arith.mulf %119, %119 : vector<8x1xf32>
    %126 = arith.subf %124, %125 : vector<8x1xf32>
    %cst_32 = arith.constant 0.000000e+00 : f32
    %127 = vector.broadcast %cst_32 : f32 to vector<8x1xf32>
    %128 = arith.maximumf %126, %127 : vector<8x1xf32>
    %129 = vector.broadcast %119 : vector<8x1xf32> to vector<8x256xf32>
    %130 = arith.subf %115, %129 : vector<8x256xf32>
    %cst_33 = arith.constant 9.99999974E-6 : f32
    %131 = vector.broadcast %cst_33 : f32 to vector<8x1xf32>
    %132 = arith.addf %128, %131 : vector<8x1xf32>
    %133 = math.rsqrt %132 : vector<8x1xf32>
    %134 = vector.broadcast %133 : vector<8x1xf32> to vector<8x256xf32>
    %135 = arith.mulf %130, %134 : vector<8x256xf32>
    %c0_34 = arith.constant 0 : index
    %c0_35 = arith.constant 0 : index
    %c0_36 = arith.constant 0 : index
    %136 = vector.load %arg3[%c0_34, %c0_35, %c0_36] : memref<1x8x256xf32, #tpu.memory_space<vmem>>, vector<1x8x256xf32>
    %137 = vector.shape_cast %136 : vector<1x8x256xf32> to vector<8x256xf32>
    %138 = vector.shape_cast %135 : vector<8x256xf32> to vector<1x8x256xf32>
    tpu.vector_store %arg3[%c0_34, %c0_35, %c0_36], %138 {strides = array<i32>} : memref<1x8x256xf32, #tpu.memory_space<vmem>>, vector<1x8x256xf32>,
    return
  }
  func.func @transform_0(%arg0: i32) -> (i32, i32, i32) {
    %c0_i32 = arith.constant 0 : i32
    %c0_i32_0 = arith.constant 0 : i32
    %c0_i32_1 = arith.constant 0 : i32
    return %arg0, %c0_i32, %c0_i32_0 : i32, i32, i32
  }
  func.func @transform_1(%arg0: i32) -> (i32, i32, i32) {
    %c0_i32 = arith.constant 0 : i32
    %c0_i32_0 = arith.constant 0 : i32
    %c0_i32_1 = arith.constant 0 : i32
    %c0_i32_2 = arith.constant 0 : i32
    return %c0_i32, %c0_i32_0, %c0_i32_1 : i32, i32, i32
  }
  func.func @transform_2(%arg0: i32) -> (i32, i32, i32) {
    %c0_i32 = arith.constant 0 : i32
    %c0_i32_0 = arith.constant 0 : i32
    %c0_i32_1 = arith.constant 0 : i32
    return %arg0, %c0_i32, %c0_i32_0 : i32, i32, i32
  }
}

</mosaic_0001>

<bundles_post_ra>
// kernel: resnet_block_forward.1
= control target key start
LH: loop header
LB: loop body
LE: loop exit
PB: predicated region body
PF: predicated region fallthrough
CT: control target
= control target key end

     0   :  { %s429_s13 = smov 127   ;;  %s430_s14 = smov 1   ;;  %v13_v3 = vlaneseq  ;;  %v433_v31 = vmov 72   ;;  %vm116_vm9 = vcmask 588800   ;;  %s641_s0 = inlined_call_operand.vmem [shape: f32[1,8,256], index: 0, kind: input, shape index: {}]   ;;  %s642_s1 = inlined_call_operand.vmem [shape: f32[2,8,73], index: 1, kind: input, shape index: {}]   ;;  %s643_s2 = inlined_call_operand.vmem [shape: f32[1,8,256], index: 2, kind: output, shape index: {}]  }
   0x1   :  { %v452_v0 = vld [vmem:[%s641_s0] sm:$0xff]  ;;  %v457_v1 = vld [vmem:[%s641_s0 + $0x8] sm:$0xff]  ;;  %s431_s15 = smov 16   ;;  %s432_s0 = smov 112   ;;  %383 = vset.pattern.permute.xlu2 %v433_v31  ;;  %424 = vset.pattern.permute.xlu0 %v433_v31 }
   0x2   :  { %v343_v2 = vpack.i.bf16 %v457_v1, %v452_v0  ;;  %v463_v4 = vand.u32 127, %v13_v3  ;;  %v26_v30 = vld [vmem:[%s642_s1] sm:$0xff]  ;;  %v27_v12 = vld [vmem:[%s642_s1 + $0x8] sm:$0xff] }
   0x4   :  { %344 = vrot.lane.b32.xlu0 %v343_v2, %s429_s13  ;;  %v466_v6 = vadd.s32 128, %v463_v4  ;;  %354 = vrot.lane.b32.xlu2 %v343_v2, %s431_s15  ;;  %v16_v7 = vand.u32 15, %v463_v4  ;;  %vm32_vm2 = vcmp.lt.s32.totalorder %v463_v4, 127  ;;  %vm39_vm3 = vcmp.lt.s32.totalorder %v463_v4, 1 }
   0x5   :  { %vm22_vm6 = vcmp.lt.s32.totalorder %v463_v4, 16  ;;  %vm64_vm7 = vcmp.lt.s32.totalorder %v463_v4, 112 }
   0x6   :  { %v17_v8 = vand.u32 15, %v466_v6  ;;  %vm471_vm0 = vcmp.eq.s32.totalorder %v16_v7, 15  ;;  %vm481_vm4 = vcmp.eq.s32.totalorder %v16_v7, 0  ;;  %vm25_vm8 = vcmp.ge.s32.totalorder %v466_v6, 240 }
   0x8   :  { %vm475_vm1 = vcmp.eq.s32.totalorder %v17_v8, 15  ;;  %vm485_vm5 = vcmp.eq.s32.totalorder %v17_v8, 0 }
   0xc   :  { %349 = vrot.lane.b32.xlu0 %v343_v2, %s430_s14  ;;  %359 = vrot.lane.b32.xlu2 %v343_v2, %s432_s0 }
  0x14   :  { %113 = vperm.xlu2 %383, %v26_v30  }
  0x5e   :  { %v355_v28 = vpop.permute.xlu2 %354 }
  0x5f   :  { %v357_v33 = vunpack.i.h.bf16 %v355_v28  ;;  %v356_v34 = vunpack.i.l.bf16 %v355_v28 }
  0x61   :  { %v83_v42 = vsel %vm22_vm6, %v356_v34, %v357_v33  ;;  %v84_v61 = vsel %vm22_vm6, %v357_v33, %v356_v34 }
  0x66   :  { %v360_v32 = vpop.permute.xlu2 %359 }
  0x67   :  { %v362_v37 = vunpack.i.h.bf16 %v360_v32  ;;  %v361_v38 = vunpack.i.l.bf16 %v360_v32 }
  0x69   :  { %v90_v46 = vsel %vm64_vm7, %v362_v37, %v361_v38  ;;  %v89_v49 = vsel %vm64_vm7, %v361_v38, %v362_v37 }
  0x6a   :  { %v94_v50 = vsel %vm25_vm8, %v83_v42, %v90_v46  ;;  %v91_v63 = vsel %vm22_vm6, %v89_v49, %v84_v61 }
  0x6e   :  { %v114_v2 = vpop.permute.xlu2 %113 }
  0x76   :  { %v345_v5 = vpop.permute.xlu0 %344 }
  0x77   :  { %v347_v9 = vunpack.i.h.bf16 %v345_v5  ;;  %v346_v10 = vunpack.i.l.bf16 %v345_v5 }
  0x79   :  { %v33_v18 = vsel %vm32_vm2, %v346_v10, %v347_v9  ;;  %v34_v19 = vsel %vm32_vm2, %v347_v9, %v346_v10 }
  0x7e   :  { %v350_v11 = vpop.permute.xlu0 %349 }
  0x7f   :  { %v352_v14 = vunpack.i.h.bf16 %v350_v11  ;;  %v351_v15 = vunpack.i.l.bf16 %v350_v11 }
  0x81   :  { %v40_v20 = vsel %vm39_vm3, %v351_v15, %v352_v14  ;;  %v41_v21 = vsel %vm39_vm3, %v352_v14, %v351_v15 }
  0x82   :  { %v52_v22 = vsel %vm471_vm0, %v41_v21, %v33_v18  ;;  %v53_v23 = vsel %vm475_vm1, %v40_v20, %v34_v19  ;;  %v46_v24 = vsel %vm481_vm4, %v33_v18, %v41_v21  ;;  %v47_v25 = vsel %vm485_vm5, %v34_v19, %v40_v20 }
  0x83   :  { %v363_v26 = vpack.i.bf16 %v53_v23, %v52_v22  ;;  %v373_v27 = vpack.i.bf16 %v47_v25, %v46_v24 }
  0x85   :  { %364 = vrot.lane.b32.xlu1 %v363_v26, %s431_s15  ;;  %374 = vrot.lane.b32.xlu0 %v373_v27, %s431_s15 }
  0x8d   :  { %369 = vrot.lane.b32.xlu1 %v363_v26, %s432_s0 }
  0x95   :  { %379 = vrot.lane.b32.xlu1 %v373_v27, %s432_s0 }
  0xf7   :  { %v365_v29 = vpop.permute.xlu1 %364  ;;  %v375_v47 = vpop.permute.xlu0 %374 }
  0xf8   :  { %v367_v35 = vunpack.i.h.bf16 %v365_v29  ;;  %v366_v36 = vunpack.i.l.bf16 %v365_v29  ;;  %v377_v51 = vunpack.i.h.bf16 %v375_v47  ;;  %v376_v52 = vunpack.i.l.bf16 %v375_v47 }
  0xfa   :  { %v99_v44 = vsel %vm22_vm6, %v366_v36, %v367_v35  ;;  %v58_v57 = vsel %vm22_vm6, %v376_v52, %v377_v51  ;;  %v100_v60 = vsel %vm22_vm6, %v367_v35, %v366_v36 }
  0xff   :  { %v370_v39 = vpop.permute.xlu1 %369 }
 0x100   :  { %v372_v40 = vunpack.i.h.bf16 %v370_v39  ;;  %v371_v41 = vunpack.i.l.bf16 %v370_v39 }
 0x102   :  { %v105_v43 = vsel %vm64_vm7, %v371_v41, %v372_v40  ;;  %v106_v45 = vsel %vm64_vm7, %v372_v40, %v371_v41 }
 0x103   :  { %126 = vmatpush.msra.mxu0 %v105_v43  ;;  %v110_v48 = vsel %vm25_vm8, %v99_v44, %v106_v45  ;;  %v107_v62 = vsel %vm22_vm6, %v105_v43, %v100_v60 }
 0x104   :  { %146 = vmatpush.msra.mxu1 %v110_v48 }
 0x105   :  { %127 = vmatpush.msra.mxu0 %v89_v49 }
 0x106   :  { %147 = vmatpush.msra.mxu1 %v94_v50 }
 0x107   :  { %v380_v53 = vpop.permute.xlu1 %379 }
 0x108   :  { %v382_v54 = vunpack.i.h.bf16 %v380_v53  ;;  %v381_v55 = vunpack.i.l.bf16 %v380_v53 }
 0x10a   :  { %v65_v56 = vsel %vm64_vm7, %v381_v55, %v382_v54  ;;  %v66_v58 = vsel %vm64_vm7, %v382_v54, %v381_v55 }
 0x10b   :  { %128 = vmatpush.msra.mxu0 %v65_v56  ;;  %v78_v59 = vsel %vm25_vm8, %v58_v57, %v66_v58 }
 0x10c   :  { %148 = vmatpush.msra.mxu1 %v78_v59 }
 0x10d   :  { %129 = vmatpush.msra.mxu0 %v52_v22 }
 0x10e   :  { %149 = vmatpush.msra.mxu1 %v53_v23 }
 0x10f   :  { %130 = vmatpush.msra.mxu0 %v452_v0  ;;  %v59_v0 = vsel %vm22_vm6, %v377_v51, %v376_v52 }
 0x110   :  { %150 = vmatpush.msra.mxu1 %v457_v1  ;;  %v71_v1 = vsel %vm22_vm6, %v65_v56, %v59_v0 }
 0x111   :  { %131 = vmatpush.msra.mxu0 %v46_v24 }
 0x112   :  { %151 = vmatpush.msra.mxu1 %v47_v25 }
 0x113   :  { %132 = vmatpush.msra.mxu0 %v107_v62 }
 0x114   :  { %152 = vmatpush.msra.mxu1 %v99_v44 }
 0x115   :  { %133 = vmatpush.msra.mxu0 %v91_v63 }
 0x116   :  { %153 = vmatpush.msra.mxu1 %v83_v42 }
 0x117   :  { %134 = vmatpush.msra.mxu0 %v71_v1 }
 0x118   :  { %154 = vmatpush.msra.mxu1 %v58_v57  ;;  %334 = vmatmul.msk.f32.vlgmr.msra.gmra.mxu0 %vm116_vm9, %v26_v30 }
 0x119   :  { %335 = vmatmul.msk.f32.vlgmr.msra.gmra.mxu1 %vm116_vm9, %v26_v30 }
 0x195   :  { %v136_v3 = vpop.f32.mrf.mxu0 }
 0x196   :  { %v137_v5 = vadd.f32 %v136_v3, %v114_v2  ;;  %v156_v7 = vpop.f32.mrf.mxu1 }
 0x197   :  { %v157_v8 = vadd.f32 %v156_v7, %v114_v2 }
 0x198   :  { %v163_v9 = vmul.f32 %v137_v5, %v137_v5 }
 0x199   :  { %v159_v10 = vadd.f32 %v157_v8, %v137_v5  ;;  %v164_v11 = vmul.f32 %v157_v8, %v157_v8 }
 0x19b   :  { %160 = vadd.xlane.f32.xlu0 %v159_v10  ;;  %v165_v14 = vadd.f32 %v164_v11, %v163_v9 }
 0x19d   :  { %166 = vadd.xlane.f32.xlu1 %v165_v14 }
 0x20e   :  { %v161_v15 = vpop.xlane.xlu0 %160 }
 0x20f   :  { %v162_v18 = vmul.f32 0.00390625, %v161_v15 }
 0x210   :  { %v167_v19 = vpop.xlane.xlu1 %166 }
 0x211   :  { %v168_v20 = vmul.f32 0.00390625, %v167_v19  ;;  %v169_v21 = vmul.f32 %v162_v18, %v162_v18  ;;  %v172_v31 = vsub.f32 %v137_v5, %v162_v18  ;;  %v173_v32 = vsub.f32 %v157_v8, %v162_v18 }
 0x213   :  { %v170_v22 = vsub.f32 %v168_v20, %v169_v21 }
 0x215   :  { %v171_v23 = vmax.f32 %v170_v22, 0.0 }
 0x217   :  { %v174_v24 = vadd.f32 1e-05, %v171_v23 }
 0x219   :  { %425 = vrsqrt.f32 %v174_v24  ;;  %vm181_vm11 = vweird.f32 %v174_v24 }
 0x21f   :  { %v426_v25 = vpop.eup %425 }
 0x220   :  { %v176_v26 = vmul.f32 %v426_v25, %v174_v24  ;;  %vm182_vm10 = vweird.f32 %v426_v25 }
 0x221   :  { %vm183_vm12 = vmor %vm181_vm11, %vm182_vm10 }
 0x222   :  { %v177_v27 = vmul.f32 %v426_v25, %v176_v26 }
 0x224   :  { %v178_v28 = vmul.f32 0.5, %v177_v27 }
 0x226   :  { %v179_v29 = vsub.f32 1.5, %v178_v28 }
 0x228   :  { %v180_v30 = vmul.f32 %v426_v25, %v179_v29 }
 0x22a   :  { %v184_v33 = vsel %vm183_vm12, %v426_v25, %v180_v30 }
 0x22b   :  { %v556_v34 = vmul.f32 %v184_v33, %v172_v31  ;;  %v558_v35 = vmul.f32 %v184_v33, %v173_v32 }
 0x22d   :  { %v187_v36 = vmax.f32 %v556_v34, 0.0  ;;  %v188_v37 = vmax.f32 %v558_v35, 0.0 }
 0x22f   :  { %v384_v38 = vpack.i.bf16 %v188_v37, %v187_v36 }
 0x231   :  { %385 = vrot.lane.b32.xlu2 %v384_v38, %s429_s13 }
 0x239   :  { %390 = vrot.lane.b32.xlu2 %v384_v38, %s430_s14 }
 0x241   :  { %395 = vrot.lane.b32.xlu2 %v384_v38, %s431_s15 }
 0x28b   :  { %v386_v39 = vpop.permute.xlu2 %385 }
 0x28c   :  { %v388_v40 = vunpack.i.h.bf16 %v386_v39  ;;  %v387_v41 = vunpack.i.l.bf16 %v386_v39 }
 0x28e   :  { %v193_v45 = vsel %vm32_vm2, %v387_v41, %v388_v40  ;;  %v194_v46 = vsel %vm32_vm2, %v388_v40, %v387_v41 }
 0x293   :  { %v391_v42 = vpop.permute.xlu2 %390 }
 0x294   :  { %v393_v43 = vunpack.i.h.bf16 %v391_v42  ;;  %v392_v44 = vunpack.i.l.bf16 %v391_v42 }
 0x296   :  { %v199_v47 = vsel %vm39_vm3, %v392_v44, %v393_v43  ;;  %v200_v48 = vsel %vm39_vm3, %v393_v43, %v392_v44 }
 0x297   :  { %v203_v49 = vsel %vm471_vm0, %v200_v48, %v193_v45  ;;  %v204_v50 = vsel %vm475_vm1, %v199_v47, %v194_v46  ;;  %v201_v51 = vsel %vm481_vm4, %v193_v45, %v200_v48  ;;  %v202_v52 = vsel %vm485_vm5, %v194_v46, %v199_v47 }
 0x298   :  { %v399_v53 = vpack.i.bf16 %v204_v50, %v203_v49  ;;  %v419_v54 = vpack.i.bf16 %v202_v52, %v201_v51 }
 0x29a   :  { %400 = vrot.lane.b32.xlu2 %v399_v53, %s431_s15  ;;  %420 = vrot.lane.b32.xlu1 %v419_v54, %s432_s0 }
 0x29b   :  { %415 = vrot.lane.b32.xlu0 %v419_v54, %s431_s15  ;;  %v396_v13 = vpop.permute.xlu2 %395 }
 0x29c   :  { %v398_v63 = vunpack.i.h.bf16 %v396_v13  ;;  %v397_v0 = vunpack.i.l.bf16 %v396_v13 }
 0x29e   :  { %v225_v7 = vsel %vm22_vm6, %v397_v0, %v398_v63  ;;  %v226_v6 = vsel %vm22_vm6, %v398_v63, %v397_v0 }
 0x2a2   :  { %405 = vrot.lane.b32.xlu2 %v399_v53, %s432_s0 }
 0x2aa   :  { %410 = vrot.lane.b32.xlu2 %v384_v38, %s432_s0 }
 0x2b2   :  { %255 = vperm.xlu2 %383, %v27_v12  }
 0x2f4   :  { %v401_v16 = vpop.permute.xlu2 %400 }
 0x2f5   :  { %v403_v17 = vunpack.i.h.bf16 %v401_v16  ;;  %v402_v55 = vunpack.i.l.bf16 %v401_v16 }
 0x2f7   :  { %v241_v60 = vsel %vm22_vm6, %v402_v55, %v403_v17  ;;  %v242_v24 = vsel %vm22_vm6, %v403_v17, %v402_v55 }
 0x2fc   :  { %v406_v56 = vpop.permute.xlu2 %405 }
 0x2fd   :  { %v408_v57 = vunpack.i.h.bf16 %v406_v56  ;;  %v407_v58 = vunpack.i.l.bf16 %v406_v56 }
 0x2ff   :  { %v247_v59 = vsel %vm64_vm7, %v407_v58, %v408_v57  ;;  %v248_v61 = vsel %vm64_vm7, %v408_v57, %v407_v58 }
 0x300   :  { %267 = vmatpush.msra.mxu2 %v247_v59  ;;  %v252_v62 = vsel %vm25_vm8, %v241_v60, %v248_v61  ;;  %v249_v25 = vsel %vm22_vm6, %v247_v59, %v242_v24 }
 0x301   :  { %287 = vmatpush.msra.mxu3 %v252_v62 }
 0x304   :  { %v411_v1 = vpop.permute.xlu2 %410 }
 0x305   :  { %v413_v2 = vunpack.i.h.bf16 %v411_v1  ;;  %v412_v3 = vunpack.i.l.bf16 %v411_v1 }
 0x307   :  { %v231_v5 = vsel %vm64_vm7, %v412_v3, %v413_v2  ;;  %v232_v8 = vsel %vm64_vm7, %v413_v2, %v412_v3 }
 0x308   :  { %268 = vmatpush.msra.mxu2 %v231_v5  ;;  %v236_v9 = vsel %vm25_vm8, %v225_v7, %v232_v8  ;;  %v233_v27 = vsel %vm22_vm6, %v231_v5, %v226_v6 }
 0x309   :  { %288 = vmatpush.msra.mxu3 %v236_v9 }
 0x30c   :  { %v421_v10 = vpop.permute.xlu1 %420  ;;  %v256_v29 = vpop.permute.xlu2 %255 }
 0x30d   :  { %v423_v11 = vunpack.i.h.bf16 %v421_v10  ;;  %v422_v14 = vunpack.i.l.bf16 %v421_v10  ;;  %v416_v15 = vpop.permute.xlu0 %415 }
 0x30e   :  { %v418_v18 = vunpack.i.h.bf16 %v416_v15  ;;  %v417_v19 = vunpack.i.l.bf16 %v416_v15 }
 0x30f   :  { %v215_v20 = vsel %vm64_vm7, %v422_v14, %v423_v11  ;;  %v216_v21 = vsel %vm64_vm7, %v423_v11, %v422_v14 }
 0x310   :  { %269 = vmatpush.msra.mxu2 %v215_v20  ;;  %v209_v22 = vsel %vm22_vm6, %v417_v19, %v418_v18  ;;  %v210_v26 = vsel %vm22_vm6, %v418_v18, %v417_v19 }
 0x311   :  { %v220_v23 = vsel %vm25_vm8, %v209_v22, %v216_v21  ;;  %v217_v28 = vsel %vm22_vm6, %v215_v20, %v210_v26 }
 0x312   :  { %289 = vmatpush.msra.mxu3 %v220_v23  ;;  %270 = vmatpush.msra.mxu2 %v203_v49 }
 0x314   :  { %290 = vmatpush.msra.mxu3 %v204_v50  ;;  %271 = vmatpush.msra.mxu2 %v187_v36 }
 0x316   :  { %291 = vmatpush.msra.mxu3 %v188_v37  ;;  %272 = vmatpush.msra.mxu2 %v201_v51 }
 0x318   :  { %292 = vmatpush.msra.mxu3 %v202_v52  ;;  %273 = vmatpush.msra.mxu2 %v249_v25 }
 0x31a   :  { %293 = vmatpush.msra.mxu3 %v241_v60  ;;  %274 = vmatpush.msra.mxu2 %v233_v27 }
 0x31c   :  { %294 = vmatpush.msra.mxu3 %v225_v7  ;;  %275 = vmatpush.msra.mxu2 %v217_v28 }
 0x31d   :  { %336 = vmatmul.msk.f32.vlgmr.msra.gmra.mxu2 %vm116_vm9, %v27_v12 }
 0x31e   :  { %295 = vmatpush.msra.mxu3 %v209_v22 }
 0x31f   :  { %337 = vmatmul.msk.f32.vlgmr.msra.gmra.mxu3 %vm116_vm9, %v27_v12 }
 0x3a0   :  { %v277_v30 = vpop.f32.mrf.mxu2 }
 0x3a1   :  { %v278_v31 = vadd.f32 %v277_v30, %v256_v29 }
 0x3a2   :  { %v297_v32 = vpop.f32.mrf.mxu3 }
 0x3a3   :  { %v298_v33 = vadd.f32 %v297_v32, %v256_v29  ;;  %v304_v34 = vmul.f32 %v278_v31, %v278_v31 }
 0x3a5   :  { %v300_v35 = vadd.f32 %v298_v33, %v278_v31  ;;  %v305_v36 = vmul.f32 %v298_v33, %v298_v33 }
 0x3a7   :  { %301 = vadd.xlane.f32.xlu2 %v300_v35  ;;  %v306_v37 = vadd.f32 %v305_v36, %v304_v34 }
 0x3a9   :  { %307 = vadd.xlane.f32.xlu0 %v306_v37 }
 0x41a   :  { %v302_v4 = vpop.xlane.xlu2 %301 }
 0x41b   :  { %v303_v38 = vmul.f32 0.00390625, %v302_v4 }
 0x41c   :  { %v308_v39 = vpop.xlane.xlu0 %307 }
 0x41d   :  { %v309_v40 = vmul.f32 0.00390625, %v308_v39  ;;  %v310_v41 = vmul.f32 %v303_v38, %v303_v38  ;;  %v313_v51 = vsub.f32 %v278_v31, %v303_v38  ;;  %v314_v52 = vsub.f32 %v298_v33, %v303_v38 }
 0x41f   :  { %v311_v42 = vsub.f32 %v309_v40, %v310_v41 }
 0x421   :  { %v312_v43 = vmax.f32 %v311_v42, 0.0 }
 0x423   :  { %v315_v44 = vadd.f32 1e-05, %v312_v43 }
 0x425   :  { %427 = vrsqrt.f32 %v315_v44  ;;  %vm322_vm14 = vweird.f32 %v315_v44 }
 0x42b   :  { %v428_v45 = vpop.eup %427 }
 0x42c   :  { %v317_v46 = vmul.f32 %v428_v45, %v315_v44  ;;  %vm323_vm13 = vweird.f32 %v428_v45 }
 0x42d   :  { %vm324_vm15 = vmor %vm322_vm14, %vm323_vm13 }
 0x42e   :  { %v318_v47 = vmul.f32 %v428_v45, %v317_v46 }
 0x430   :  { %v319_v48 = vmul.f32 0.5, %v318_v47 }
 0x432   :  { %v320_v49 = vsub.f32 1.5, %v319_v48 }
 0x434   :  { %v321_v50 = vmul.f32 %v428_v45, %v320_v49 }
 0x436   :  { %v325_v53 = vsel %vm324_vm15, %v428_v45, %v321_v50 }
 0x437   :  { %v326_v54 = vmul.f32 %v325_v53, %v313_v51  ;;  %v327_v12 = vmul.f32 %v325_v53, %v314_v52 }
 0x439   :  { %328 = vst [vmem:[%s643_s2] sm:$0xff] %v326_v54 }
 0x43a   :  { %329 = vst [vmem:[%s643_s2 + $0x8] sm:$0xff] %v327_v12 }

</bundles_post_ra>
